<compile_context>
chip_gen: v5e
topology: v5e:2x2
jax: 0.10.0
libtpu: 0.0.40
codegen_flags: <defaults>
</compile_context>

<pallas_src>
import jax
import jax.numpy as jnp
from jax.experimental import pallas as pl
from jax.experimental.pallas import tpu as pltpu


def _round_up(x, m):
    return ((x + m - 1) // m) * m


def _tpu_budget():
    """(physical VMEM bytes per TensorCore, #TensorCores) with a conservative
    fallback when the query is unavailable."""
    try:
        vmem = int(pltpu.get_tpu_info().vmem_capacity_bytes)
    except Exception:                      # non-TPU trace / old runtime
        vmem = 64 * 1024 * 1024            # v7x-sized, safe everywhere
    # v7x: 64 MiB/TC, 2 TCs.  v5e/v6e: 128 MiB, single TC.
    cores = 2 if vmem <= 64 * 1024 * 1024 else 1
    return vmem, cores


def _pick_tm(M, D, H, A_pad, x_itemsize, vmem_bytes, cores):
    """Largest 16-aligned row tile whose full footprint fits the VMEM budget."""
    # Resident, single-buffered weights + biases.
    resident = D * H * 2 + H * A_pad * 2 + (H + A_pad) * 4
    # Per-row cost: 2x-buffered x block (original dtype), 2x-buffered f32
    # logits block, bf16 h scratch, plus ~4 B/elem of f32 h live in epilogue.
    per_row = 2 * D * x_itemsize + 2 * A_pad * 4 + H * 2 + H * 4
    budget = int(vmem_bytes * 0.75) - resident       # headroom for temps
    tm_cap = 1024 if cores == 1 else 512
    m_pad = _round_up(max(M, 16), 16)
    if cores == 1:
        # Single TensorCore: one grid step when it fits (latency-bound
        # rollout calls; avoids the ~0.35us per-step pipeline overhead).
        tm = m_pad
    else:
        # Two TensorCores (v7x): aim for ~4 grid steps so both stay busy.
        tm = _round_up(max(pl.cdiv(M, 4), 16), 16)
    tm = min(tm, tm_cap, m_pad)
    while tm > 16 and tm * per_row > budget:
        tm = _round_up(tm // 2, 16)
    return max(tm, 16)


# ---------------------------------------------------------------------------
# Pallas kernel: fused trunk + action head. (argmax is done by the caller.)
# ---------------------------------------------------------------------------
def agent_kernel(x_ref, we_ref, be_ref, wh_ref, bh_ref, logits_ref, h_bf16):
    # trunk: pi_latent = relu(x @ W_enc + b_enc)
    # x arrives in its original dtype; cast to bf16 in-kernel (saves a
    # separate XLA cast pass and a second read of x from HBM).
    x = x_ref[...].astype(jnp.bfloat16)
    h = jnp.dot(x, we_ref[...], preferred_element_type=jnp.float32)
    h = jnp.maximum(h + be_ref[...], 0.0)                      # (tm, H) f32
    # Explicit bf16 VMEM scratch caps the live intermediate at 2 B/elem.
    h_bf16[...] = h.astype(jnp.bfloat16)

    # action head: pi_logits = h @ W_head + b_head; lane-dense (tm, A_pad).
    logits = jnp.dot(h_bf16[...], wh_ref[...],
                     preferred_element_type=jnp.float32)
    logits_ref[...] = logits + bh_ref[...]


def _policy_call(x_flat, w_enc, b_enc, w_head, b_head, *, tm, vmem_limit,
                 single_buffer_resident):
    M, D = x_flat.shape
    H = w_enc.shape[1]
    A_pad = w_head.shape[1]
    grid = (pl.cdiv(M, tm),)

    # Constant-index inputs (weights + biases) never change block index, so a
    # second pipeline buffer is pure VMEM waste -> single-buffer them.
    res_kwargs = ({"pipeline_mode": pl.Buffered(1)}
                  if single_buffer_resident else {})

    flops = 2 * M * (D * H + H * A_pad)
    bytes_accessed = (x_flat.size * x_flat.dtype.itemsize
                      + w_enc.size * w_enc.dtype.itemsize
                      + b_enc.size * b_enc.dtype.itemsize
                      + w_head.size * w_head.dtype.itemsize
                      + b_head.size * b_head.dtype.itemsize
                      + M * A_pad * 4)

    return pl.pallas_call(
        agent_kernel,
        out_shape=jax.ShapeDtypeStruct((M, A_pad), jnp.float32),
        grid_spec=pltpu.PrefetchScalarGridSpec(
            num_scalar_prefetch=0,
            grid=grid,
            in_specs=[
                pl.BlockSpec((tm, D), lambda i: (i, 0)),                   # obs rows
                pl.BlockSpec((D, H), lambda i: (0, 0), **res_kwargs),      # trunk W
                pl.BlockSpec((1, H), lambda i: (0, 0), **res_kwargs),      # trunk b
                pl.BlockSpec((H, A_pad), lambda i: (0, 0), **res_kwargs),  # head W
                pl.BlockSpec((1, A_pad), lambda i: (0, 0), **res_kwargs),  # head b
            ],
            out_specs=pl.BlockSpec((tm, A_pad), lambda i: (i, 0)),         # logits
            scratch_shapes=[pltpu.VMEM((tm, H), jnp.bfloat16)],            # pi_latent
        ),
        compiler_params=pltpu.CompilerParams(
            dimension_semantics=("parallel",),
            vmem_limit_bytes=int(vmem_limit)),
        cost_estimate=pl.CostEstimate(
            flops=int(flops), transcendentals=0,
            bytes_accessed=int(bytes_accessed)),
    )(x_flat, w_enc, b_enc, w_head, b_head)


def fused_policy_logits(x_flat, w_enc, b_enc, w_head_pad, b_head_pad, *, tm=None):
    """x_flat: (M, D) rows in their original dtype.  Weights are bf16, biases
    f32; hidden/action axes are pre-padded to multiples of 128 (zero weights,
    -1e30 head bias).  Returns PADDED, lane-dense logits (M, A_pad) float32."""
    M, D = x_flat.shape
    H = w_enc.shape[1]
    A_pad = w_head_pad.shape[1]
    vmem_bytes, cores = _tpu_budget()
    if tm is None:
        tm = _pick_tm(M, D, H, A_pad, x_flat.dtype.itemsize, vmem_bytes, cores)
    vmem_limit = max(vmem_bytes * 3 // 4, 32 * 1024 * 1024)
    try:
        return _policy_call(x_flat, w_enc, b_enc, w_head_pad, b_head_pad,
                            tm=tm, vmem_limit=vmem_limit,
                            single_buffer_resident=True)
    except Exception:
        # Safe fallback if this runtime rejects pl.Buffered(1) on resident
        # inputs; numerics are identical, only VMEM usage differs.
        return _policy_call(x_flat, w_enc, b_enc, w_head_pad, b_head_pad,
                            tm=tm, vmem_limit=vmem_limit,
                            single_buffer_resident=False)


# ---------------------------------------------------------------------------
# Minimal concrete agent mirroring BaseAgent.get_action semantics.
# ---------------------------------------------------------------------------
class PallasAgent:
    def __init__(self, d_in, hidden, n_actions, key):
        k1, k2, k3, k4 = jax.random.split(key, 4)
        self.hidden = hidden
        self.n_actions = n_actions
        # Lane-dense padding of hidden / action axes to multiples of 128:
        # padded hidden cols are zero (relu(0+0)=0, contribute 0 downstream);
        # padded action cols get zero weight + -1e30 bias so argmax is
        # unaffected.  Callers should also keep D a multiple of 128 when they
        # control the observation encoding (left to callers here).
        # TODO(synk): pad H / A_pad to 256 on v6e/v7x to fully feed the
        # 2x256x256 MXUs (128 is enough on v5e).
        h_pad = _round_up(hidden, 128)
        a_pad = _round_up(n_actions, 128)
        # torch.nn.Linear stores weight (out, in); pre-transposed to (in, out)
        # so the kernel computes x @ W directly.  Weights live in bf16
        # (MXU-native), biases stay f32.
        w_enc = (jax.random.normal(k1, (d_in, hidden), jnp.float32)
                 * (1.0 / jnp.sqrt(d_in)))
        b_enc = jax.random.normal(k2, (1, hidden), jnp.float32) * 0.01
        w_head = (jax.random.normal(k3, (hidden, n_actions), jnp.float32)
                  * (1.0 / jnp.sqrt(hidden)))
        b_head = jax.random.normal(k4, (1, n_actions), jnp.float32) * 0.01
        self.w_enc = jnp.pad(
            w_enc, ((0, 0), (0, h_pad - hidden))).astype(jnp.bfloat16)
        self.b_enc = jnp.pad(b_enc, ((0, 0), (0, h_pad - hidden)))
        self.w_head = jnp.pad(
            w_head, ((0, h_pad - hidden), (0, a_pad - n_actions))
        ).astype(jnp.bfloat16)
        self.b_head = jnp.pad(b_head, ((0, 0), (0, a_pad - n_actions)),
                              constant_values=-1e30)

    def initial_state(self, batch_size):
        return [jnp.zeros((batch_size, self.hidden), jnp.float32)]

    def _batchify(self, elem):
        # equivalent of BaseAgent._batchify: add batch and time dims.
        return jnp.asarray(elem)[None, None, ...]

    def get_action(self, obs, state_in, first=None, deterministic=True,
                   input_shape="BT*"):
        if input_shape == "*":
            obs = {k: self._batchify(v) for k, v in obs.items()}
            if state_in is not None:
                state_in = [s[None] for s in state_in]
        elif input_shape != "BT*":
            raise NotImplementedError
        # TODO(synk): stochastic sampling (deterministic=False) and a recurrent
        # trunk/state path are not implemented; only the deterministic argmax
        # path with a stateless trunk is realised.
        x = obs["obs"]                                   # (B, T, D)
        B, T, D = x.shape
        logits_pad = fused_policy_logits(
            x.reshape(B * T, D), self.w_enc, self.b_enc,
            self.w_head, self.b_head)
        # deterministic sample == argmax over the action axis; reduce over the
        # PADDED lane-dense logits (padded cols hold -1e30 so they never win),
        # avoiding a lane-sparse relayout copy before the reduce.
        action_flat = jnp.argmax(logits_pad, axis=-1).astype(jnp.int32)
        action = {"action": action_flat.reshape(B, T)}
        state_out = state_in if state_in is not None else self.initial_state(B)
        if input_shape == "BT*":
            return action, state_out
        return ({k: v[0][0] for k, v in action.items()},
                [s[0] for s in state_out])


# ---------------------------------------------------------------------------
# Pure-JAX reference for correctness checking (mirrors the bf16 casts).
# ---------------------------------------------------------------------------
def reference_policy(x_flat, w_enc, b_enc, w_head_pad, b_head_pad, n_actions):
    xf = x_flat.astype(jnp.bfloat16).astype(jnp.float32)
    h = jnp.maximum(xf @ w_enc.astype(jnp.float32) + b_enc, 0.0)
    hf = h.astype(jnp.bfloat16).astype(jnp.float32)
    logits_pad = hf @ w_head_pad.astype(jnp.float32) + b_head_pad
    action = jnp.argmax(logits_pad, axis=-1).astype(jnp.int32)
    return logits_pad[:, :n_actions], action


if __name__ == "__main__":
    key = jax.random.PRNGKey(0)
    k_param, k_obs = jax.random.split(key)

    B, T, D, H, A = 2, 8, 32, 32, 16
    agent = PallasAgent(d_in=D, hidden=H, n_actions=A, key=k_param)

    obs = {"obs": jax.random.normal(k_obs, (B, T, D), jnp.float32)}
    state_in = agent.initial_state(B)
    first = jnp.zeros((B, T), jnp.bool_)

    action, state_out = agent.get_action(obs, state_in, first=first,
                                         deterministic=True,
                                         input_shape="BT*")
    jax.block_until_ready(action["action"])
    jax.block_until_ready(state_out[0])

    # correctness check against pure-JAX reference
    x_flat = obs["obs"].reshape(B * T, D)
    ref_logits, ref_action = reference_policy(
        x_flat, agent.w_enc, agent.b_enc, agent.w_head, agent.b_head, A)
    got_pad = fused_policy_logits(x_flat, agent.w_enc, agent.b_enc,
                                  agent.w_head, agent.b_head)
    jax.block_until_ready(got_pad)
    got_logits = got_pad[:, :A]
    got_action = jnp.argmax(got_pad, axis=-1).astype(jnp.int32)

    assert got_pad.shape == (B * T, agent.w_head.shape[1])
    assert jnp.allclose(got_logits, ref_logits, atol=5e-3, rtol=5e-3), \
        float(jnp.max(jnp.abs(got_logits - ref_logits)))
    assert jnp.array_equal(got_action, ref_action)
    assert jnp.array_equal(action["action"].reshape(-1), ref_action)
    assert action["action"].shape == (B, T)

    print("KERNEL_OK")
</pallas_src>

<mosaic_0001>
module attributes {stable_mosaic.version = 11 : i64} {
  func.func @agent_kernel(%arg0: i32, %arg1: memref<16x32xf32, #tpu.memory_space<vmem>>, %arg2: memref<32x128xbf16, #tpu.memory_space<vmem>>, %arg3: memref<1x128xf32, #tpu.memory_space<vmem>>, %arg4: memref<128x128xbf16, #tpu.memory_space<vmem>>, %arg5: memref<1x128xf32, #tpu.memory_space<vmem>>, %arg6: memref<16x128xf32, #tpu.memory_space<vmem>>, %arg7: memref<16x128xbf16, #tpu.memory_space<vmem>>) attributes {dimension_semantics = [#tpu.dimension_semantics<parallel>], iteration_bounds = array<i64: 1>, scalar_prefetch = 0 : i64, scratch_operands = 1 : i64, tpu.core_type = #tpu.core_type<tc>, window_params = [{transform_indices = @transform_0, window_bounds = array<i64: 16, 32>}, {pipeline_mode = #tpu.pipeline_mode<synchronous>, transform_indices = @transform_1, window_bounds = array<i64: 32, 128>}, {pipeline_mode = #tpu.pipeline_mode<synchronous>, transform_indices = @transform_2, window_bounds = array<i64: 1, 128>}, {pipeline_mode = #tpu.pipeline_mode<synchronous>, transform_indices = @transform_3, window_bounds = array<i64: 128, 128>}, {pipeline_mode = #tpu.pipeline_mode<synchronous>, transform_indices = @transform_4, window_bounds = array<i64: 1, 128>}, {transform_indices = @transform_5, window_bounds = array<i64: 16, 128>}]} {
    %c0 = arith.constant 0 : index
    %c0_0 = arith.constant 0 : index
    %0 = vector.load %arg1[%c0, %c0_0] : memref<16x32xf32, #tpu.memory_space<vmem>>, vector<16x32xf32>
    %1 = arith.truncf %0 : vector<16x32xf32> to vector<16x32xbf16>
    %c0_1 = arith.constant 0 : index
    %c0_2 = arith.constant 0 : index
    %2 = vector.load %arg2[%c0_1, %c0_2] : memref<32x128xbf16, #tpu.memory_space<vmem>>, vector<32x128xbf16>
    %cst = arith.constant dense<0.000000e+00> : vector<16x128xf32>
    %3 = tpu.matmul %1, %2, %cst {dimension_numbers = #tpu.dot_dimension_numbers<[1], [0], [0], [1], [0, 0, 1, 1], [], []>} : vector<16x32xbf16>, vector<32x128xbf16>, vector<16x128xf32> -> vector<16x128xf32>
    %c0_3 = arith.constant 0 : index
    %c0_4 = arith.constant 0 : index
    %4 = vector.load %arg3[%c0_3, %c0_4] : memref<1x128xf32, #tpu.memory_space<vmem>>, vector<1x128xf32>
    %5 = vector.broadcast %4 : vector<1x128xf32> to vector<16x128xf32>
    %6 = arith.addf %3, %5 : vector<16x128xf32>
    %cst_5 = arith.constant 0.000000e+00 : f32
    %7 = vector.broadcast %cst_5 : f32 to vector<16x128xf32>
    %8 = arith.maximumf %6, %7 : vector<16x128xf32>
    %9 = arith.truncf %8 : vector<16x128xf32> to vector<16x128xbf16>
    %c0_6 = arith.constant 0 : index
    %c0_7 = arith.constant 0 : index
    %10 = vector.load %arg7[%c0_6, %c0_7] : memref<16x128xbf16, #tpu.memory_space<vmem>>, vector<16x128xbf16>
    tpu.vector_store %arg7[%c0_6, %c0_7], %9 {strides = array<i32>} : memref<16x128xbf16, #tpu.memory_space<vmem>>, vector<16x128xbf16>,
    %c0_8 = arith.constant 0 : index
    %c0_9 = arith.constant 0 : index
    %11 = vector.load %arg7[%c0_8, %c0_9] : memref<16x128xbf16, #tpu.memory_space<vmem>>, vector<16x128xbf16>
    %c0_10 = arith.constant 0 : index
    %c0_11 = arith.constant 0 : index
    %12 = vector.load %arg4[%c0_10, %c0_11] : memref<128x128xbf16, #tpu.memory_space<vmem>>, vector<128x128xbf16>
    %cst_12 = arith.constant dense<0.000000e+00> : vector<16x128xf32>
    %13 = tpu.matmul %11, %12, %cst_12 {dimension_numbers = #tpu.dot_dimension_numbers<[1], [0], [0], [1], [0, 0, 1, 1], [], []>} : vector<16x128xbf16>, vector<128x128xbf16>, vector<16x128xf32> -> vector<16x128xf32>
    %c0_13 = arith.constant 0 : index
    %c0_14 = arith.constant 0 : index
    %14 = vector.load %arg5[%c0_13, %c0_14] : memref<1x128xf32, #tpu.memory_space<vmem>>, vector<1x128xf32>
    %15 = vector.broadcast %14 : vector<1x128xf32> to vector<16x128xf32>
    %16 = arith.addf %13, %15 : vector<16x128xf32>
    %c0_15 = arith.constant 0 : index
    %c0_16 = arith.constant 0 : index
    %17 = vector.load %arg6[%c0_15, %c0_16] : memref<16x128xf32, #tpu.memory_space<vmem>>, vector<16x128xf32>
    tpu.vector_store %arg6[%c0_15, %c0_16], %16 {strides = array<i32>} : memref<16x128xf32, #tpu.memory_space<vmem>>, vector<16x128xf32>,
    return
  }
  func.func @transform_0(%arg0: i32) -> (i32, i32) {
    %c0_i32 = arith.constant 0 : i32
    %c0_i32_0 = arith.constant 0 : i32
    return %arg0, %c0_i32 : i32, i32
  }
  func.func @transform_1(%arg0: i32) -> (i32, i32) {
    %c0_i32 = arith.constant 0 : i32
    %c0_i32_0 = arith.constant 0 : i32
    %c0_i32_1 = arith.constant 0 : i32
    return %c0_i32, %c0_i32_0 : i32, i32
  }
  func.func @transform_2(%arg0: i32) -> (i32, i32) {
    %c0_i32 = arith.constant 0 : i32
    %c0_i32_0 = arith.constant 0 : i32
    %c0_i32_1 = arith.constant 0 : i32
    return %c0_i32, %c0_i32_0 : i32, i32
  }
  func.func @transform_3(%arg0: i32) -> (i32, i32) {
    %c0_i32 = arith.constant 0 : i32
    %c0_i32_0 = arith.constant 0 : i32
    %c0_i32_1 = arith.constant 0 : i32
    return %c0_i32, %c0_i32_0 : i32, i32
  }
  func.func @transform_4(%arg0: i32) -> (i32, i32) {
    %c0_i32 = arith.constant 0 : i32
    %c0_i32_0 = arith.constant 0 : i32
    %c0_i32_1 = arith.constant 0 : i32
    return %c0_i32, %c0_i32_0 : i32, i32
  }
  func.func @transform_5(%arg0: i32) -> (i32, i32) {
    %c0_i32 = arith.constant 0 : i32
    %c0_i32_0 = arith.constant 0 : i32
    return %arg0, %c0_i32 : i32, i32
  }
}

module attributes {stable_mosaic.version = 11 : i64} {
  func.func @agent_kernel(%arg0: i32, %arg1: memref<16x32xf32, #tpu.memory_space<vmem>>, %arg2: memref<32x128xbf16, #tpu.memory_space<vmem>>, %arg3: memref<1x128xf32, #tpu.memory_space<vmem>>, %arg4: memref<128x128xbf16, #tpu.memory_space<vmem>>, %arg5: memref<1x128xf32, #tpu.memory_space<vmem>>, %arg6: memref<16x128xf32, #tpu.memory_space<vmem>>, %arg7: memref<16x128xbf16, #tpu.memory_space<vmem>>) attributes {dimension_semantics = [#tpu.dimension_semantics<parallel>], iteration_bounds = array<i64: 1>, scalar_prefetch = 0 : i64, scratch_operands = 1 : i64, tpu.core_type = #tpu.core_type<tc>, window_params = [{transform_indices = @transform_0, window_bounds = array<i64: 16, 32>}, {pipeline_mode = #tpu.pipeline_mode<synchronous>, transform_indices = @transform_1, window_bounds = array<i64: 32, 128>}, {pipeline_mode = #tpu.pipeline_mode<synchronous>, transform_indices = @transform_2, window_bounds = array<i64: 1, 128>}, {pipeline_mode = #tpu.pipeline_mode<synchronous>, transform_indices = @transform_3, window_bounds = array<i64: 128, 128>}, {pipeline_mode = #tpu.pipeline_mode<synchronous>, transform_indices = @transform_4, window_bounds = array<i64: 1, 128>}, {transform_indices = @transform_5, window_bounds = array<i64: 16, 128>}]} {
    %c0 = arith.constant 0 : index
    %c0_0 = arith.constant 0 : index
    %0 = vector.load %arg1[%c0, %c0_0] : memref<16x32xf32, #tpu.memory_space<vmem>>, vector<16x32xf32>
    %1 = arith.truncf %0 : vector<16x32xf32> to vector<16x32xbf16>
    %c0_1 = arith.constant 0 : index
    %c0_2 = arith.constant 0 : index
    %2 = vector.load %arg2[%c0_1, %c0_2] : memref<32x128xbf16, #tpu.memory_space<vmem>>, vector<32x128xbf16>
    %cst = arith.constant dense<0.000000e+00> : vector<16x128xf32>
    %3 = tpu.matmul %1, %2, %cst {dimension_numbers = #tpu.dot_dimension_numbers<[1], [0], [0], [1], [0, 0, 1, 1], [], []>} : vector<16x32xbf16>, vector<32x128xbf16>, vector<16x128xf32> -> vector<16x128xf32>
    %c0_3 = arith.constant 0 : index
    %c0_4 = arith.constant 0 : index
    %4 = vector.load %arg3[%c0_3, %c0_4] : memref<1x128xf32, #tpu.memory_space<vmem>>, vector<1x128xf32>
    %5 = vector.broadcast %4 : vector<1x128xf32> to vector<16x128xf32>
    %6 = arith.addf %3, %5 : vector<16x128xf32>
    %cst_5 = arith.constant 0.000000e+00 : f32
    %7 = vector.broadcast %cst_5 : f32 to vector<16x128xf32>
    %8 = arith.maximumf %6, %7 : vector<16x128xf32>
    %9 = arith.truncf %8 : vector<16x128xf32> to vector<16x128xbf16>
    %c0_6 = arith.constant 0 : index
    %c0_7 = arith.constant 0 : index
    %10 = vector.load %arg7[%c0_6, %c0_7] : memref<16x128xbf16, #tpu.memory_space<vmem>>, vector<16x128xbf16>
    tpu.vector_store %arg7[%c0_6, %c0_7], %9 {strides = array<i32>} : memref<16x128xbf16, #tpu.memory_space<vmem>>, vector<16x128xbf16>,
    %c0_8 = arith.constant 0 : index
    %c0_9 = arith.constant 0 : index
    %11 = vector.load %arg7[%c0_8, %c0_9] : memref<16x128xbf16, #tpu.memory_space<vmem>>, vector<16x128xbf16>
    %c0_10 = arith.constant 0 : index
    %c0_11 = arith.constant 0 : index
    %12 = vector.load %arg4[%c0_10, %c0_11] : memref<128x128xbf16, #tpu.memory_space<vmem>>, vector<128x128xbf16>
    %cst_12 = arith.constant dense<0.000000e+00> : vector<16x128xf32>
    %13 = tpu.matmul %11, %12, %cst_12 {dimension_numbers = #tpu.dot_dimension_numbers<[1], [0], [0], [1], [0, 0, 1, 1], [], []>} : vector<16x128xbf16>, vector<128x128xbf16>, vector<16x128xf32> -> vector<16x128xf32>
    %c0_13 = arith.constant 0 : index
    %c0_14 = arith.constant 0 : index
    %14 = vector.load %arg5[%c0_13, %c0_14] : memref<1x128xf32, #tpu.memory_space<vmem>>, vector<1x128xf32>
    %15 = vector.broadcast %14 : vector<1x128xf32> to vector<16x128xf32>
    %16 = arith.addf %13, %15 : vector<16x128xf32>
    %c0_15 = arith.constant 0 : index
    %c0_16 = arith.constant 0 : index
    %17 = vector.load %arg6[%c0_15, %c0_16] : memref<16x128xf32, #tpu.memory_space<vmem>>, vector<16x128xf32>
    tpu.vector_store %arg6[%c0_15, %c0_16], %16 {strides = array<i32>} : memref<16x128xf32, #tpu.memory_space<vmem>>, vector<16x128xf32>,
    return
  }
  func.func @transform_0(%arg0: i32) -> (i32, i32) {
    %c0_i32 = arith.constant 0 : i32
    %c0_i32_0 = arith.constant 0 : i32
    return %arg0, %c0_i32 : i32, i32
  }
  func.func @transform_1(%arg0: i32) -> (i32, i32) {
    %c0_i32 = arith.constant 0 : i32
    %c0_i32_0 = arith.constant 0 : i32
    %c0_i32_1 = arith.constant 0 : i32
    return %c0_i32, %c0_i32_0 : i32, i32
  }
  func.func @transform_2(%arg0: i32) -> (i32, i32) {
    %c0_i32 = arith.constant 0 : i32
    %c0_i32_0 = arith.constant 0 : i32
    %c0_i32_1 = arith.constant 0 : i32
    return %c0_i32, %c0_i32_0 : i32, i32
  }
  func.func @transform_3(%arg0: i32) -> (i32, i32) {
    %c0_i32 = arith.constant 0 : i32
    %c0_i32_0 = arith.constant 0 : i32
    %c0_i32_1 = arith.constant 0 : i32
    return %c0_i32, %c0_i32_0 : i32, i32
  }
  func.func @transform_4(%arg0: i32) -> (i32, i32) {
    %c0_i32 = arith.constant 0 : i32
    %c0_i32_0 = arith.constant 0 : i32
    %c0_i32_1 = arith.constant 0 : i32
    return %c0_i32, %c0_i32_0 : i32, i32
  }
  func.func @transform_5(%arg0: i32) -> (i32, i32) {
    %c0_i32 = arith.constant 0 : i32
    %c0_i32_0 = arith.constant 0 : i32
    return %arg0, %c0_i32 : i32, i32
  }
}

</mosaic_0001>

<bundles_post_ra>
// kernel: tpu_custom_call.1
= control target key start
LH: loop header
LB: loop body
LE: loop exit
PB: predicated region body
PF: predicated region fallthrough
CT: control target
= control target key end

     0   :  { %10 = vsyncpa [#allocation4], 0  ;;  %s463_s0 = inlined_call_operand.hbm [shape: f32[16,32], index: 0, kind: input, shape index: {}]   ;;  %s464_s1 = inlined_call_operand.hbm [shape: bf16[32,128], index: 1, kind: input, shape index: {}]   ;;  %s465_s2 = inlined_call_operand.vmem [shape: f32[1,128], index: 2, kind: input, shape index: {}]   ;;  %s466_s3 = inlined_call_operand.hbm [shape: bf16[128,128], index: 3, kind: input, shape index: {}]   ;;  %s467_s4 = inlined_call_operand.vmem [shape: f32[1,128], index: 4, kind: input, shape index: {}]   ;;  %s468_s5 = inlined_call_operand.hbm [shape: f32[16,128], index: 5, kind: output, shape index: {}]  }
   0x1   :  { %11 = vsyncpa [#allocation7], 0  ;;  %s30_s20 = sshll.u32 %s464_s1, 4  ;;  %s31_s20 = int_to_ptr.hbm [resolvable:$true] %s30_s20 }
   0x2   :  { %12 = vsyncpa [#allocation5], 0  ;;  %s401_s21 = smov [#allocation6]   ;;  %s17_s25 = sshll.u32 %s463_s0, 4  ;;  %s18_s25 = int_to_ptr.hbm [resolvable:$true] %s17_s25 }
   0x3   :  { %s32_s22 = sshll.u32 %s401_s21, 4  ;;  %s402_s26 = smov 64   ;;  %s33_s22 = int_to_ptr.vmem [resolvable:$true] %s32_s22 }
   0x4   :  { %s403_s27 = smov 4   ;;  %s404_s28 = smov [#allocation3]  }
   0x5   :  { %38 = dma.hbm_to_vmem [thread:$0]  %s31_s20, 256, %s33_s22, [#allocation7], %s402_s26, %s402_s26, %s403_s27  }
   0x6   :  { %s19_s29 = sshll.u32 %s404_s28, 4  ;;  %s405_s30 = smov 128   ;;  %s20_s29 = int_to_ptr.vmem [resolvable:$true] %s19_s29 }
   0x7   :  { %s406_s6 = smov 8   ;;  %s45_s8 = sshll.u32 %s466_s3, 4  ;;  %s46_s8 = int_to_ptr.hbm [resolvable:$true] %s45_s8 }
   0x8   :  { %25 = dma.hbm_to_vmem [thread:$0]  %s18_s25, 256, %s20_s29, [#allocation4], %s405_s30, %s405_s30, %s406_s6  }
   0x9   :  { %s407_s9 = smov [#allocation8]  }
   0xa   :  { %s47_s0 = sshll.u32 %s407_s9, 4  ;;  %s48_s0 = int_to_ptr.vmem [resolvable:$true] %s47_s0 }
   0xb   :  { %53 = dma.hbm_to_vmem [thread:$0]  %s46_s8, 1024, %s48_s0, [#allocation7], %s402_s26, %s402_s26, %s403_s27  }
   0xc   :  { %395 = dma.done.wait [#allocation4], 256  }
   0xd   :  { %396 = vsyncadd [#allocation4], 4294967040 }
   0xe   :  { %397 = dma.done.wait [#allocation7], 1280  }
   0xf   :  { %398 = vsyncadd [#allocation7], 4294966016  ;;  %v274_v0 = vld [vmem:[#allocation6 + $0x8] sm:$0xff]  ;;  %v273_v1 = vld [vmem:[#allocation6] sm:$0xff]  ;;  %vm92_vm0 = vcmask 261120   ;;  %s408_s13 = smov [#allocation9]  }
  0x10   :  { %v69_v2 = vld [vmem:[#allocation3] sm:$0xff]  ;;  %v283_v3 = vld [vmem:[#allocation8 + $0x38] sm:$0xff]  ;;  %102 = vmatpush.bf16.msra.mxu0 %v274_v0  ;;  %v70_v4 = vld [vmem:[#allocation3 + $0x8] sm:$0xff]  ;;  %s212_s14 = sshll.u32 %s408_s13, 4  ;;  %s214_s16 = sshll.u32 %s468_s5, 4  ;;  %s213_s14 = int_to_ptr.vmem [resolvable:$true] %s212_s14  ;;  %s215_s16 = int_to_ptr.hbm [resolvable:$true] %s214_s16 }
  0x11   :  { %192 = vmatpush.bf16.msra.mxu1 %v283_v3  ;;  %v282_v5 = vld [vmem:[#allocation8 + $0x30] sm:$0xff]  ;;  %v71_v6 = vpack.c.bf16 %v70_v4, %v69_v2  ;;  %v281_v7 = vld [vmem:[#allocation8 + $0x28] sm:$0xff]  ;;  %v280_v8 = vld [vmem:[#allocation8 + $0x20] sm:$0xff] }
  0x12   :  { %v279_v9 = vld [vmem:[#allocation8 + $0x18] sm:$0xff]  ;;  %v278_v10 = vld [vmem:[#allocation8 + $0x10] sm:$0xff]  ;;  %v277_v11 = vld [vmem:[#allocation8 + $0x8] sm:$0xff] }
  0x13   :  { %v276_v12 = vld [vmem:[#allocation8] sm:$0xff]  ;;  %v297_v14 = vld [vmem:[%s465_s2] ss:$0 sm:$0xff] }
  0x14   :  { %103 = vmatpush.bf16.msra.mxu0 %v273_v1  ;;  %v298_v22 = vld [vmem:[%s467_s4] ss:$0 sm:$0xff] }
  0x15   :  { %193 = vmatpush.bf16.msra.mxu1 %v282_v5 }
  0x17   :  { %236 = vmatmul.msk.bf16.vlgmr.msra.gmra.mxu0 %vm92_vm0, %v71_v6 }
  0x19   :  { %194 = vmatpush.bf16.msra.mxu1 %v281_v7 }
  0x1d   :  { %195 = vmatpush.bf16.msra.mxu1 %v280_v8 }
  0x21   :  { %196 = vmatpush.bf16.msra.mxu1 %v279_v9 }
  0x25   :  { %197 = vmatpush.bf16.msra.mxu1 %v278_v10 }
  0x29   :  { %198 = vmatpush.bf16.msra.mxu1 %v277_v11 }
  0x2d   :  { %199 = vmatpush.bf16.msra.mxu1 %v276_v12 }
  0x94   :  { %v105_v13 = vpop.f32.mrf.mxu0 }
  0x95   :  { %v106_v15 = vadd.f32 %v297_v14, %v105_v13 }
  0x97   :  { %v110_v18 = vmax.f32 %v106_v15, 0.0 }
  0x9c   :  { %v107_v16 = vpop.f32.mrf.mxu0 }
  0x9d   :  { %v108_v17 = vadd.f32 %v297_v14, %v107_v16 }
  0x9f   :  { %v111_v19 = vmax.f32 %v108_v17, 0.0 }
  0xa1   :  { %v287_v20 = vpack.c.bf16 %v111_v19, %v110_v18 }
  0xa3   :  { %288 = vst [vmem:[#allocation2] sm:$0xff] %v287_v20  }
  0xaa   :  { %v275_v21 = vld [vmem:[#allocation2] sm:$0xff] }
  0xab   :  { %200 = vmatmul.bf16.vlgmr.msra.gmra.mxu1 %v275_v21 }
 0x128   :  { %v201_v23 = vpop.f32.mrf.mxu1 }
 0x129   :  { %v202_v24 = vadd.f32 %v298_v22, %v201_v23 }
 0x12b   :  { %206 = vst [vmem:[#allocation9] sm:$0xff] %v202_v24 }
 0x130   :  { %v203_v25 = vpop.f32.mrf.mxu1 }
 0x131   :  { %v204_v26 = vadd.f32 %v298_v22, %v203_v25 }
 0x133   :  { %207 = vst [vmem:[#allocation9 + $0x8] sm:$0xff] %v204_v26 }
 0x134   :  { %220 = dma.vmem_to_hbm [thread:$0]  %s213_s14, 256, %s215_s16, [#allocation5], %s405_s30, %s405_s30, %s406_s6  }
 0x135   :  { %399 = dma.done.wait [#allocation5], 256  }
 0x136   :  { %400 = vsyncadd [#allocation5], 4294967040 }
 0x137   :  { %225 = vsyncpa [#allocation4], 1 }
 0x138   :  { %226 = vsyncpa [#allocation7], 1 }
 0x139   :  { %227 = vsyncpa [#allocation5], 1 }

// kernel: tpu_custom_call.1
= control target key start
LH: loop header
LB: loop body
LE: loop exit
PB: predicated region body
PF: predicated region fallthrough
CT: control target
= control target key end

     0   :  { %10 = vsyncpa [#allocation4], 0  ;;  %s463_s0 = inlined_call_operand.hbm [shape: f32[16,32], index: 0, kind: input, shape index: {}]   ;;  %s464_s1 = inlined_call_operand.hbm [shape: bf16[32,128], index: 1, kind: input, shape index: {}]   ;;  %s465_s2 = inlined_call_operand.vmem [shape: f32[1,128], index: 2, kind: input, shape index: {}]   ;;  %s466_s3 = inlined_call_operand.hbm [shape: bf16[128,128], index: 3, kind: input, shape index: {}]   ;;  %s467_s4 = inlined_call_operand.vmem [shape: f32[1,128], index: 4, kind: input, shape index: {}]   ;;  %s468_s5 = inlined_call_operand.hbm [shape: f32[16,128], index: 5, kind: output, shape index: {}]  }
   0x1   :  { %11 = vsyncpa [#allocation7], 0  ;;  %s30_s20 = sshll.u32 %s464_s1, 4  ;;  %s31_s20 = int_to_ptr.hbm [resolvable:$true] %s30_s20 }
   0x2   :  { %12 = vsyncpa [#allocation5], 0  ;;  %s401_s21 = smov [#allocation6]   ;;  %s17_s25 = sshll.u32 %s463_s0, 4  ;;  %s18_s25 = int_to_ptr.hbm [resolvable:$true] %s17_s25 }
   0x3   :  { %s32_s22 = sshll.u32 %s401_s21, 4  ;;  %s402_s26 = smov 64   ;;  %s33_s22 = int_to_ptr.vmem [resolvable:$true] %s32_s22 }
   0x4   :  { %s403_s27 = smov 4   ;;  %s404_s28 = smov [#allocation3]  }
   0x5   :  { %38 = dma.hbm_to_vmem [thread:$0]  %s31_s20, 256, %s33_s22, [#allocation7], %s402_s26, %s402_s26, %s403_s27  }
   0x6   :  { %s19_s29 = sshll.u32 %s404_s28, 4  ;;  %s405_s30 = smov 128   ;;  %s20_s29 = int_to_ptr.vmem [resolvable:$true] %s19_s29 }
   0x7   :  { %s406_s6 = smov 8   ;;  %s45_s8 = sshll.u32 %s466_s3, 4  ;;  %s46_s8 = int_to_ptr.hbm [resolvable:$true] %s45_s8 }
   0x8   :  { %25 = dma.hbm_to_vmem [thread:$0]  %s18_s25, 256, %s20_s29, [#allocation4], %s405_s30, %s405_s30, %s406_s6  }
   0x9   :  { %s407_s9 = smov [#allocation8]  }
   0xa   :  { %s47_s0 = sshll.u32 %s407_s9, 4  ;;  %s48_s0 = int_to_ptr.vmem [resolvable:$true] %s47_s0 }
   0xb   :  { %53 = dma.hbm_to_vmem [thread:$0]  %s46_s8, 1024, %s48_s0, [#allocation7], %s402_s26, %s402_s26, %s403_s27  }
   0xc   :  { %395 = dma.done.wait [#allocation4], 256  }
   0xd   :  { %396 = vsyncadd [#allocation4], 4294967040 }
   0xe   :  { %397 = dma.done.wait [#allocation7], 1280  }
   0xf   :  { %398 = vsyncadd [#allocation7], 4294966016  ;;  %v274_v0 = vld [vmem:[#allocation6 + $0x8] sm:$0xff]  ;;  %v273_v1 = vld [vmem:[#allocation6] sm:$0xff]  ;;  %vm92_vm0 = vcmask 261120   ;;  %s408_s13 = smov [#allocation9]  }
  0x10   :  { %v69_v2 = vld [vmem:[#allocation3] sm:$0xff]  ;;  %v283_v3 = vld [vmem:[#allocation8 + $0x38] sm:$0xff]  ;;  %102 = vmatpush.bf16.msra.mxu0 %v274_v0  ;;  %v70_v4 = vld [vmem:[#allocation3 + $0x8] sm:$0xff]  ;;  %s212_s14 = sshll.u32 %s408_s13, 4  ;;  %s214_s16 = sshll.u32 %s468_s5, 4  ;;  %s213_s14 = int_to_ptr.vmem [resolvable:$true] %s212_s14  ;;  %s215_s16 = int_to_ptr.hbm [resolvable:$true] %s214_s16 }
  0x11   :  { %192 = vmatpush.bf16.msra.mxu1 %v283_v3  ;;  %v282_v5 = vld [vmem:[#allocation8 + $0x30] sm:$0xff]  ;;  %v71_v6 = vpack.c.bf16 %v70_v4, %v69_v2  ;;  %v281_v7 = vld [vmem:[#allocation8 + $0x28] sm:$0xff]  ;;  %v280_v8 = vld [vmem:[#allocation8 + $0x20] sm:$0xff] }
  0x12   :  { %v279_v9 = vld [vmem:[#allocation8 + $0x18] sm:$0xff]  ;;  %v278_v10 = vld [vmem:[#allocation8 + $0x10] sm:$0xff]  ;;  %v277_v11 = vld [vmem:[#allocation8 + $0x8] sm:$0xff] }
  0x13   :  { %v276_v12 = vld [vmem:[#allocation8] sm:$0xff]  ;;  %v297_v14 = vld [vmem:[%s465_s2] ss:$0 sm:$0xff] }
  0x14   :  { %103 = vmatpush.bf16.msra.mxu0 %v273_v1  ;;  %v298_v22 = vld [vmem:[%s467_s4] ss:$0 sm:$0xff] }
  0x15   :  { %193 = vmatpush.bf16.msra.mxu1 %v282_v5 }
  0x17   :  { %236 = vmatmul.msk.bf16.vlgmr.msra.gmra.mxu0 %vm92_vm0, %v71_v6 }
  0x19   :  { %194 = vmatpush.bf16.msra.mxu1 %v281_v7 }
  0x1d   :  { %195 = vmatpush.bf16.msra.mxu1 %v280_v8 }
  0x21   :  { %196 = vmatpush.bf16.msra.mxu1 %v279_v9 }
  0x25   :  { %197 = vmatpush.bf16.msra.mxu1 %v278_v10 }
  0x29   :  { %198 = vmatpush.bf16.msra.mxu1 %v277_v11 }
  0x2d   :  { %199 = vmatpush.bf16.msra.mxu1 %v276_v12 }
  0x94   :  { %v105_v13 = vpop.f32.mrf.mxu0 }
  0x95   :  { %v106_v15 = vadd.f32 %v297_v14, %v105_v13 }
  0x97   :  { %v110_v18 = vmax.f32 %v106_v15, 0.0 }
  0x9c   :  { %v107_v16 = vpop.f32.mrf.mxu0 }
  0x9d   :  { %v108_v17 = vadd.f32 %v297_v14, %v107_v16 }
  0x9f   :  { %v111_v19 = vmax.f32 %v108_v17, 0.0 }
  0xa1   :  { %v287_v20 = vpack.c.bf16 %v111_v19, %v110_v18 }
  0xa3   :  { %288 = vst [vmem:[#allocation2] sm:$0xff] %v287_v20  }
  0xaa   :  { %v275_v21 = vld [vmem:[#allocation2] sm:$0xff] }
  0xab   :  { %200 = vmatmul.bf16.vlgmr.msra.gmra.mxu1 %v275_v21 }
 0x128   :  { %v201_v23 = vpop.f32.mrf.mxu1 }
 0x129   :  { %v202_v24 = vadd.f32 %v298_v22, %v201_v23 }
 0x12b   :  { %206 = vst [vmem:[#allocation9] sm:$0xff] %v202_v24 }
 0x130   :  { %v203_v25 = vpop.f32.mrf.mxu1 }
 0x131   :  { %v204_v26 = vadd.f32 %v298_v22, %v203_v25 }
 0x133   :  { %207 = vst [vmem:[#allocation9 + $0x8] sm:$0xff] %v204_v26 }
 0x134   :  { %220 = dma.vmem_to_hbm [thread:$0]  %s213_s14, 256, %s215_s16, [#allocation5], %s405_s30, %s405_s30, %s406_s6  }
 0x135   :  { %399 = dma.done.wait [#allocation5], 256  }
 0x136   :  { %400 = vsyncadd [#allocation5], 4294967040 }
 0x137   :  { %225 = vsyncpa [#allocation4], 1 }
 0x138   :  { %226 = vsyncpa [#allocation7], 1 }
 0x139   :  { %227 = vsyncpa [#allocation5], 1 }

</bundles_post_ra>
